<compile_context>
chip_gen: v5e
topology: v5e:2x2
jax: 0.10.0
libtpu: 0.0.40
codegen_flags: <defaults>
</compile_context>

<pallas_src>
import functools

import jax
import jax.numpy as jnp
from jax.experimental import pallas as pl
from jax.experimental.pallas import tpu as pltpu

_LANE = 128
_ROW_CHUNK = 8       # sublanes processed per inner compute step (one vreg row-group)
_MAX_TAPS = 1024     # hard cap on statically-unrolled FIR taps


def _round_up(n, m):
    return ((n + m - 1) // m) * m


def _convoluve_kernel(pad_left, x_hbm, taps_ref, mix_ref, out_ref, buf, sem):
    # x_hbm:    (n_rows+1, C)       HBM (ANY)  padded signal, row r = padded[r*C:(r+1)*C]
    # taps_ref: (K,)                SMEM f32   time-reversed IR, pre-scaled by wet_rate
    # mix_ref:  (1,)                SMEM f32   1 - wet_rate
    # out_ref:  (ROWS, C)           VMEM       x.dtype
    # buf:      (2, ROWS, C+HALO)   VMEM       double-buffered input tile (+ halo lanes)
    # sem:      (2, 2)              DMA sems   [slot, {body, halo}]
    ROWS, C = out_ref.shape
    HALO = buf.shape[-1] - C
    K = taps_ref.shape[0]

    n_inner = pl.num_programs(1)
    o = pl.program_id(0)
    i = pl.program_id(1)
    tile = o * n_inner + i
    slot = i % 2

    def dma_pair(t, s):
        row0 = t * ROWS
        body = pltpu.make_async_copy(
            x_hbm.at[pl.ds(row0, ROWS)],
            buf.at[s, :, pl.ds(0, C)],
            sem.at[s, 0])
        halo = pltpu.make_async_copy(
            x_hbm.at[pl.ds(row0 + 1, ROWS), pl.ds(0, HALO)],
            buf.at[s, :, pl.ds(C, HALO)],
            sem.at[s, 1])
        return body, halo

    # Prime the pipeline at the start of each serial (inner) chain.  Because the
    # prime sits on the inner ("arbitrary") axis, it fires on every core even when
    # the outer ("parallel") axis is megacore-sharded.
    @pl.when(i == 0)
    def _():
        b, h = dma_pair(tile, slot)
        b.start()
        h.start()

    # Scalar SMEM reads hoisted ahead of the DMA waits (sst->sld forwarding).
    taps = [taps_ref[j] for j in range(K)]       # already scaled by wet_rate
    dry_scale = mix_ref[0]                       # 1 - wet_rate

    # Wait for the current tile's data.
    b, h = dma_pair(tile, slot)
    b.wait()
    h.wait()

    # Prefetch the next tile into the other slot; overlaps with the compute below.
    @pl.when(i + 1 < n_inner)
    def _():
        b2, h2 = dma_pair(tile + 1, 1 - slot)
        b2.start()
        h2.start()

    src = buf.at[slot]
    # 2-4 independent partial accumulators; fewer when the lane width is large so
    # the live set (accs + current slice + dry) stays within the 64-vreg file.
    n_acc = max(1, min(K, 4 if C <= 1024 else 2))

    @pl.loop(0, ROWS // _ROW_CHUNK)
    def _(rc):
        r0 = pl.multiple_of(rc * _ROW_CHUNK, _ROW_CHUNK)
        rsl = pl.ds(r0, _ROW_CHUNK)
        # Static, unrolled shifted-slice FIR read directly from the VMEM ref.
        parts = [taps[j] * src[rsl, j:j + C].astype(jnp.float32)
                 for j in range(n_acc)]
        for j in range(n_acc, K):
            parts[j % n_acc] = parts[j % n_acc] + \
                taps[j] * src[rsl, j:j + C].astype(jnp.float32)
        while len(parts) > 1:                    # tree-sum the partial accumulators
            nxt = [parts[p] + parts[p + 1] for p in range(0, len(parts) - 1, 2)]
            if len(parts) % 2:
                nxt.append(parts[-1])
            parts = nxt
        wet = parts[0]
        dry = src[rsl, pad_left:pad_left + C].astype(jnp.float32)
        out_ref[rsl, :] = (dry_scale * dry + wet).astype(out_ref.dtype)


def convoluve(x, ir, wet_rate, *, tile_lanes=2048, rows=128, outer_splits=4):
    """'same'-mode 1-D convolution of x with ir, mixed with the dry signal.

    x: (T,) float signal, ir: (K,) impulse response, wet_rate: python float/0-d array.
    """
    if x.ndim != 1 or ir.ndim != 1:
        raise ValueError("x and ir must be 1-D")
    if not jnp.issubdtype(x.dtype, jnp.floating):
        # The original module only ever sees float audio; integer dtypes would
        # silently truncate on the final cast, so reject them explicitly.
        raise TypeError("Convoluve Pallas kernel supports floating-point signals only")
    T = int(x.shape[0])
    K = int(ir.shape[0])
    if K > _MAX_TAPS:
        # TODO(synk): FFT / overlap-save path for very long impulse responses.
        raise NotImplementedError(f"IR longer than {_MAX_TAPS} taps not supported")

    c = (K - 1) // 2                  # 'same'-mode centring of the full convolution
    pad_left = K - 1 - c              # == K // 2
    halo = _round_up(max(K - 1, 1), _LANE)

    rows = _round_up(max(int(rows), _ROW_CHUNK), _ROW_CHUNK)
    lanes_needed = _round_up(-(-T // rows), _LANE)
    C = max(_LANE, halo, min(_round_up(int(tile_lanes), _LANE), lanes_needed))

    samples_per_tile = rows * C
    num_tiles = -(-T // samples_per_tile)
    outer = max(1, min(int(outer_splits), num_tiles))     # megacore-shardable axis
    inner = -(-num_tiles // outer)                        # serial prefetch chain
    outer = -(-num_tiles // inner)
    n_tiles_padded = outer * inner
    n_rows = n_tiles_padded * rows
    t_round = n_rows * C

    # One contiguous zero-pad (no gather): pad_left zeros in front for the 'same'
    # offset, right padding up to the rounded length plus one extra halo row.
    total = t_round + C
    xg = jnp.pad(x, (pad_left, total - T - pad_left))
    x2d = xg.reshape(n_rows + 1, C)               # flat -> row view, no data movement

    wet = jnp.asarray(wet_rate, jnp.float32)
    taps = ir[::-1].astype(jnp.float32) * wet     # conv == correlation w/ reversed IR;
    mix = (1.0 - wet).reshape(1)                  # wet mix folded into the taps

    itm = x.dtype.itemsize
    vmem_bytes = 2 * rows * (C + halo) * itm + 2 * rows * C * itm + (1 << 20)
    assert vmem_bytes <= 24 * 1024 * 1024, "tile too large for v7x VMEM budget"

    grid_spec = pltpu.PrefetchScalarGridSpec(
        num_scalar_prefetch=0,
        grid=(outer, inner),
        in_specs=[
            pl.BlockSpec(memory_space=pl.ANY),                   # raw HBM signal
            pl.BlockSpec(memory_space=pltpu.MemorySpace.SMEM),   # taps (scaled)
            pl.BlockSpec(memory_space=pltpu.MemorySpace.SMEM),   # 1 - wet_rate
        ],
        out_specs=pl.BlockSpec((rows, C), lambda o, i: (o * inner + i, 0)),
        scratch_shapes=[
            pltpu.VMEM((2, rows, C + halo), x.dtype),   # double-buffered input tile
            pltpu.SemaphoreType.DMA((2, 2)),            # [slot, {body, halo}]
        ],
    )

    out = pl.pallas_call(
        functools.partial(_convoluve_kernel, pad_left),
        out_shape=jax.ShapeDtypeStruct((n_rows, C), x.dtype),
        grid_spec=grid_spec,
        compiler_params=pltpu.CompilerParams(
            dimension_semantics=("parallel", "arbitrary"),
            vmem_limit_bytes=32 * 1024 * 1024,
        ),
        cost_estimate=pl.CostEstimate(
            flops=2 * K * n_rows * C,
            bytes_accessed=(n_rows + 1) * C * itm + n_rows * C * itm,
            transcendentals=0,
        ),
    )(x2d, taps, mix)

    return out.reshape(-1)[:T]


if __name__ == "__main__":
    key = jax.random.PRNGKey(0)
    k_x, _ = jax.random.split(key)

    T = 8000          # signal length (not a multiple of the tile -> exercises padding)
    K = 9             # impulse-response taps
    wet_rate = 0.4

    # Deterministic inputs (synthetic IR: decaying exponential, unit sum).
    x = jax.random.normal(k_x, (T,), dtype=jnp.float32)
    ir = jnp.exp(-jnp.arange(K, dtype=jnp.float32) / 3.0)
    ir = ir / jnp.sum(ir)

    # Pure-JAX reference of the PyTorch/scipy semantics.
    wet_ref = jnp.convolve(x, ir, mode="same")
    ref = x * (1.0 - wet_rate) + wet_ref * wet_rate

    # Small tiles: 4 tiles of (16, 128) -> grid (outer=2 parallel, inner=2 serial),
    # exercising the prime, the cross-step prefetch and the multi-row-chunk loop.
    out = convoluve(x, ir, wet_rate, tile_lanes=128, rows=16, outer_splits=2)
    out = jax.block_until_ready(out)
    assert out.shape == x.shape and out.dtype == x.dtype
    assert jnp.allclose(out, ref, atol=1e-5, rtol=1e-5), "mismatch (small tiles)"

    # Default (large-block) configuration: single tile for this short signal.
    out2 = jax.block_until_ready(convoluve(x, ir, wet_rate))
    assert jnp.allclose(out2, ref, atol=1e-5, rtol=1e-5), "mismatch (default tiles)"

    print("KERNEL_OK")
</pallas_src>

<mosaic_0001>
module attributes {stable_mosaic.version = 11 : i64} {
  func.func @_convoluve_kernel(%arg0: i32, %arg1: i32, %arg2: memref<65x128xf32, #tpu.memory_space<any>>, %arg3: memref<9xf32, #tpu.memory_space<smem>>, %arg4: memref<1xf32, #tpu.memory_space<smem>>, %arg5: memref<16x128xf32, #tpu.memory_space<vmem>>, %arg6: memref<2x16x256xf32, #tpu.memory_space<vmem>>, %arg7: memref<2x2x!tpu.dma_semaphore, #tpu.memory_space<semaphore_mem>>) attributes {dimension_semantics = [#tpu.dimension_semantics<parallel>, #tpu.dimension_semantics<arbitrary>], iteration_bounds = array<i64: 2, 2>, scalar_prefetch = 0 : i64, scratch_operands = 2 : i64, tpu.core_type = #tpu.core_type<tc>, window_params = [{}, {transform_indices = @transform_1, window_bounds = array<i64: 9>}, {transform_indices = @transform_2, window_bounds = array<i64: 1>}, {transform_indices = @transform_3, window_bounds = array<i64: 16, 128>}]} {
    %c2_i32 = arith.constant 2 : i32
    %0 = arith.muli %arg0, %c2_i32 : i32
    %1 = arith.addi %0, %arg1 : i32
    %c2_i32_0 = arith.constant 2 : i32
    %c0_i32 = arith.constant 0 : i32
    %2 = arith.cmpi eq, %c2_i32_0, %c0_i32 : i32
    %c1_i32 = arith.constant 1 : i32
    %3 = arith.select %2, %c1_i32, %c2_i32_0 : i32
    %4 = arith.remsi %arg1, %3 : i32
    %c0_i32_1 = arith.constant 0 : i32
    %5 = arith.cmpi ne, %4, %c0_i32_1 : i32
    %c0_i32_2 = arith.constant 0 : i32
    %6 = arith.cmpi slt, %4, %c0_i32_2 : i32
    %c0_i32_3 = arith.constant 0 : i32
    %7 = arith.cmpi slt, %3, %c0_i32_3 : i32
    %8 = arith.xori %6, %7 : i1
    %9 = arith.andi %8, %5 : i1
    %10 = arith.addi %4, %3 : i32
    %11 = arith.select %9, %10, %4 : i32
    %c0_i32_4 = arith.constant 0 : i32
    %12 = arith.cmpi eq, %arg1, %c0_i32_4 : i32
    %13 = arith.extui %12 : i1 to i32
    %c0_i32_5 = arith.constant 0 : i32
    %14 = arith.cmpi ne, %13, %c0_i32_5 : i32
    scf.if %14 {
      %c16_i32_22 = arith.constant 16 : i32
      %42 = arith.muli %1, %c16_i32_22 : i32
      %c1_i32_23 = arith.constant 1 : i32
      %43 = arith.addi %42, %c1_i32_23 : i32
      %c0_i32_24 = arith.constant 0 : i32
      %c0_i32_25 = arith.constant 0 : i32
      %44 = tpu.memref_slice %arg2[%42, %c0_i32_25] : memref<65x128xf32, #tpu.memory_space<any>> -> memref<16x128xf32, #tpu.memory_space<any>>
      %c0_i32_26 = arith.constant 0 : i32
      %c0_i32_27 = arith.constant 0 : i32
      %45 = tpu.memref_slice %arg6[%11, %c0_i32_26, %c0_i32_27] : memref<2x16x256xf32, #tpu.memory_space<vmem>> -> memref<1x16x128xf32, #tpu.memory_space<vmem>>
      %46 = tpu.memref_squeeze %45 : memref<1x16x128xf32, #tpu.memory_space<vmem>> -> memref<16x128xf32, #tpu.memory_space<vmem>>
      %47 = tpu.memref_slice %arg7[%11, %c0_i32_24] : memref<2x2x!tpu.dma_semaphore, #tpu.memory_space<semaphore_mem>> -> memref<1x1x!tpu.dma_semaphore, #tpu.memory_space<semaphore_mem>>
      %48 = tpu.memref_squeeze %47 : memref<1x1x!tpu.dma_semaphore, #tpu.memory_space<semaphore_mem>> -> memref<!tpu.dma_semaphore, #tpu.memory_space<semaphore_mem>>
      tpu.enqueue_dma source(%44 : memref<16x128xf32, #tpu.memory_space<any>>) target(%46 : memref<16x128xf32, #tpu.memory_space<vmem>>) target_semaphore(%48 : memref<!tpu.dma_semaphore, #tpu.memory_space<semaphore_mem>>)
      %c1_i32_28 = arith.constant 1 : i32
      %c0_i32_29 = arith.constant 0 : i32
      %49 = tpu.memref_slice %arg2[%43, %c0_i32_29] : memref<65x128xf32, #tpu.memory_space<any>> -> memref<16x128xf32, #tpu.memory_space<any>>
      %c0_i32_30 = arith.constant 0 : i32
      %c128_i32_31 = arith.constant 128 : i32
      %50 = tpu.memref_slice %arg6[%11, %c0_i32_30, %c128_i32_31] : memref<2x16x256xf32, #tpu.memory_space<vmem>> -> memref<1x16x128xf32, #tpu.memory_space<vmem>>
      %51 = tpu.memref_squeeze %50 : memref<1x16x128xf32, #tpu.memory_space<vmem>> -> memref<16x128xf32, #tpu.memory_space<vmem>>
      %52 = tpu.memref_slice %arg7[%11, %c1_i32_28] : memref<2x2x!tpu.dma_semaphore, #tpu.memory_space<semaphore_mem>> -> memref<1x1x!tpu.dma_semaphore, #tpu.memory_space<semaphore_mem>>
      %53 = tpu.memref_squeeze %52 : memref<1x1x!tpu.dma_semaphore, #tpu.memory_space<semaphore_mem>> -> memref<!tpu.dma_semaphore, #tpu.memory_space<semaphore_mem>>
      tpu.enqueue_dma source(%49 : memref<16x128xf32, #tpu.memory_space<any>>) target(%51 : memref<16x128xf32, #tpu.memory_space<vmem>>) target_semaphore(%53 : memref<!tpu.dma_semaphore, #tpu.memory_space<semaphore_mem>>)
    } else {
    }
    %c0 = arith.constant 0 : index
    %15 = memref.load %arg3[%c0] : memref<9xf32, #tpu.memory_space<smem>>
    %c1 = arith.constant 1 : index
    %16 = memref.load %arg3[%c1] : memref<9xf32, #tpu.memory_space<smem>>
    %c2 = arith.constant 2 : index
    %17 = memref.load %arg3[%c2] : memref<9xf32, #tpu.memory_space<smem>>
    %c3 = arith.constant 3 : index
    %18 = memref.load %arg3[%c3] : memref<9xf32, #tpu.memory_space<smem>>
    %c4 = arith.constant 4 : index
    %19 = memref.load %arg3[%c4] : memref<9xf32, #tpu.memory_space<smem>>
    %c5 = arith.constant 5 : index
    %20 = memref.load %arg3[%c5] : memref<9xf32, #tpu.memory_space<smem>>
    %c6 = arith.constant 6 : index
    %21 = memref.load %arg3[%c6] : memref<9xf32, #tpu.memory_space<smem>>
    %c7 = arith.constant 7 : index
    %22 = memref.load %arg3[%c7] : memref<9xf32, #tpu.memory_space<smem>>
    %c8 = arith.constant 8 : index
    %23 = memref.load %arg3[%c8] : memref<9xf32, #tpu.memory_space<smem>>
    %c0_6 = arith.constant 0 : index
    %24 = memref.load %arg4[%c0_6] : memref<1xf32, #tpu.memory_space<smem>>
    %c16_i32 = arith.constant 16 : i32
    %25 = arith.muli %1, %c16_i32 : i32
    %c1_i32_7 = arith.constant 1 : i32
    %26 = arith.addi %25, %c1_i32_7 : i32
    %c0_i32_8 = arith.constant 0 : i32
    %c0_i32_9 = arith.constant 0 : i32
    %27 = tpu.memref_slice %arg2[%25, %c0_i32_9] : memref<65x128xf32, #tpu.memory_space<any>> -> memref<16x128xf32, #tpu.memory_space<any>>
    %c0_i32_10 = arith.constant 0 : i32
    %c0_i32_11 = arith.constant 0 : i32
    %28 = tpu.memref_slice %arg6[%11, %c0_i32_10, %c0_i32_11] : memref<2x16x256xf32, #tpu.memory_space<vmem>> -> memref<1x16x128xf32, #tpu.memory_space<vmem>>
    %29 = tpu.memref_squeeze %28 : memref<1x16x128xf32, #tpu.memory_space<vmem>> -> memref<16x128xf32, #tpu.memory_space<vmem>>
    %30 = tpu.memref_slice %arg7[%11, %c0_i32_8] : memref<2x2x!tpu.dma_semaphore, #tpu.memory_space<semaphore_mem>> -> memref<1x1x!tpu.dma_semaphore, #tpu.memory_space<semaphore_mem>>
    %31 = tpu.memref_squeeze %30 : memref<1x1x!tpu.dma_semaphore, #tpu.memory_space<semaphore_mem>> -> memref<!tpu.dma_semaphore, #tpu.memory_space<semaphore_mem>>
    tpu.wait_dma2 semaphore(%31 : memref<!tpu.dma_semaphore, #tpu.memory_space<semaphore_mem>>) src(%27 : memref<16x128xf32, #tpu.memory_space<any>>) dst(%29 : memref<16x128xf32, #tpu.memory_space<vmem>>)
    %c1_i32_12 = arith.constant 1 : i32
    %c0_i32_13 = arith.constant 0 : i32
    %32 = tpu.memref_slice %arg2[%26, %c0_i32_13] : memref<65x128xf32, #tpu.memory_space<any>> -> memref<16x128xf32, #tpu.memory_space<any>>
    %c0_i32_14 = arith.constant 0 : i32
    %c128_i32 = arith.constant 128 : i32
    %33 = tpu.memref_slice %arg6[%11, %c0_i32_14, %c128_i32] : memref<2x16x256xf32, #tpu.memory_space<vmem>> -> memref<1x16x128xf32, #tpu.memory_space<vmem>>
    %34 = tpu.memref_squeeze %33 : memref<1x16x128xf32, #tpu.memory_space<vmem>> -> memref<16x128xf32, #tpu.memory_space<vmem>>
    %35 = tpu.memref_slice %arg7[%11, %c1_i32_12] : memref<2x2x!tpu.dma_semaphore, #tpu.memory_space<semaphore_mem>> -> memref<1x1x!tpu.dma_semaphore, #tpu.memory_space<semaphore_mem>>
    %36 = tpu.memref_squeeze %35 : memref<1x1x!tpu.dma_semaphore, #tpu.memory_space<semaphore_mem>> -> memref<!tpu.dma_semaphore, #tpu.memory_space<semaphore_mem>>
    tpu.wait_dma2 semaphore(%36 : memref<!tpu.dma_semaphore, #tpu.memory_space<semaphore_mem>>) src(%32 : memref<16x128xf32, #tpu.memory_space<any>>) dst(%34 : memref<16x128xf32, #tpu.memory_space<vmem>>)
    %c1_i32_15 = arith.constant 1 : i32
    %37 = arith.addi %arg1, %c1_i32_15 : i32
    %c2_i32_16 = arith.constant 2 : i32
    %38 = arith.cmpi slt, %37, %c2_i32_16 : i32
    %39 = arith.extui %38 : i1 to i32
    %c0_i32_17 = arith.constant 0 : i32
    %40 = arith.cmpi ne, %39, %c0_i32_17 : i32
    scf.if %40 {
      %c1_i32_22 = arith.constant 1 : i32
      %42 = arith.addi %1, %c1_i32_22 : i32
      %c1_i32_23 = arith.constant 1 : i32
      %43 = arith.subi %c1_i32_23, %11 : i32
      %c16_i32_24 = arith.constant 16 : i32
      %44 = arith.muli %42, %c16_i32_24 : i32
      %c1_i32_25 = arith.constant 1 : i32
      %45 = arith.addi %44, %c1_i32_25 : i32
      %c0_i32_26 = arith.constant 0 : i32
      %c0_i32_27 = arith.constant 0 : i32
      %46 = tpu.memref_slice %arg2[%44, %c0_i32_27] : memref<65x128xf32, #tpu.memory_space<any>> -> memref<16x128xf32, #tpu.memory_space<any>>
      %c0_i32_28 = arith.constant 0 : i32
      %c0_i32_29 = arith.constant 0 : i32
      %47 = tpu.memref_slice %arg6[%43, %c0_i32_28, %c0_i32_29] : memref<2x16x256xf32, #tpu.memory_space<vmem>> -> memref<1x16x128xf32, #tpu.memory_space<vmem>>
      %48 = tpu.memref_squeeze %47 : memref<1x16x128xf32, #tpu.memory_space<vmem>> -> memref<16x128xf32, #tpu.memory_space<vmem>>
      %49 = tpu.memref_slice %arg7[%43, %c0_i32_26] : memref<2x2x!tpu.dma_semaphore, #tpu.memory_space<semaphore_mem>> -> memref<1x1x!tpu.dma_semaphore, #tpu.memory_space<semaphore_mem>>
      %50 = tpu.memref_squeeze %49 : memref<1x1x!tpu.dma_semaphore, #tpu.memory_space<semaphore_mem>> -> memref<!tpu.dma_semaphore, #tpu.memory_space<semaphore_mem>>
      tpu.enqueue_dma source(%46 : memref<16x128xf32, #tpu.memory_space<any>>) target(%48 : memref<16x128xf32, #tpu.memory_space<vmem>>) target_semaphore(%50 : memref<!tpu.dma_semaphore, #tpu.memory_space<semaphore_mem>>)
      %c1_i32_30 = arith.constant 1 : i32
      %c0_i32_31 = arith.constant 0 : i32
      %51 = tpu.memref_slice %arg2[%45, %c0_i32_31] : memref<65x128xf32, #tpu.memory_space<any>> -> memref<16x128xf32, #tpu.memory_space<any>>
      %c0_i32_32 = arith.constant 0 : i32
      %c128_i32_33 = arith.constant 128 : i32
      %52 = tpu.memref_slice %arg6[%43, %c0_i32_32, %c128_i32_33] : memref<2x16x256xf32, #tpu.memory_space<vmem>> -> memref<1x16x128xf32, #tpu.memory_space<vmem>>
      %53 = tpu.memref_squeeze %52 : memref<1x16x128xf32, #tpu.memory_space<vmem>> -> memref<16x128xf32, #tpu.memory_space<vmem>>
      %54 = tpu.memref_slice %arg7[%43, %c1_i32_30] : memref<2x2x!tpu.dma_semaphore, #tpu.memory_space<semaphore_mem>> -> memref<1x1x!tpu.dma_semaphore, #tpu.memory_space<semaphore_mem>>
      %55 = tpu.memref_squeeze %54 : memref<1x1x!tpu.dma_semaphore, #tpu.memory_space<semaphore_mem>> -> memref<!tpu.dma_semaphore, #tpu.memory_space<semaphore_mem>>
      tpu.enqueue_dma source(%51 : memref<16x128xf32, #tpu.memory_space<any>>) target(%53 : memref<16x128xf32, #tpu.memory_space<vmem>>) target_semaphore(%55 : memref<!tpu.dma_semaphore, #tpu.memory_space<semaphore_mem>>)
    } else {
    }
    %c0_i32_18 = arith.constant 0 : i32
    %c2_i32_19 = arith.constant 2 : i32
    %41 = arith.addi %c0_i32_18, %c2_i32_19 : i32
    %c1_i32_20 = arith.constant 1 : i32
    scf.for %arg8 = %c0_i32_18 to %41 step %c1_i32_20  : i32 {
      %c1_i32_22 = arith.constant 1 : i32
      %42 = arith.muli %arg8, %c1_i32_22 : i32
      %c0_i32_23 = arith.constant 0 : i32
      %43 = arith.addi %c0_i32_23, %42 : i32
      %c8_i32 = arith.constant 8 : i32
      %44 = arith.muli %43, %c8_i32 : i32
      %45 = tpu.assume_multiple %44, 8 : i32
      %c0_i32_24 = arith.constant 0 : i32
      %c0_i32_25 = arith.constant 0 : i32
      %46 = tpu.memref_slice %arg6[%11, %c0_i32_24, %c0_i32_25] : memref<2x16x256xf32, #tpu.memory_space<vmem>> -> memref<1x16x256xf32, #tpu.memory_space<vmem>>
      %47 = tpu.memref_squeeze %46 : memref<1x16x256xf32, #tpu.memory_space<vmem>> -> memref<16x256xf32, #tpu.memory_space<vmem>>
      %48 = arith.index_cast %45 : i32 to index
      %c0_26 = arith.constant 0 : index
      %49 = vector.load %47[%48, %c0_26] : memref<16x256xf32, #tpu.memory_space<vmem>>, vector<8x128xf32>
      %50 = vector.broadcast %15 : f32 to vector<8x128xf32>
      %51 = arith.mulf %50, %49 : vector<8x128xf32>
      %c0_i32_27 = arith.constant 0 : i32
      %c0_i32_28 = arith.constant 0 : i32
      %52 = tpu.memref_slice %arg6[%11, %c0_i32_27, %c0_i32_28] : memref<2x16x256xf32, #tpu.memory_space<vmem>> -> memref<1x16x256xf32, #tpu.memory_space<vmem>>
      %53 = tpu.memref_squeeze %52 : memref<1x16x256xf32, #tpu.memory_space<vmem>> -> memref<16x256xf32, #tpu.memory_space<vmem>>
      %54 = arith.index_cast %45 : i32 to index
      %c1_29 = arith.constant 1 : index
      %55 = vector.load %53[%54, %c1_29] : memref<16x256xf32, #tpu.memory_space<vmem>>, vector<8x128xf32>
      %56 = vector.broadcast %16 : f32 to vector<8x128xf32>
      %57 = arith.mulf %56, %55 : vector<8x128xf32>
      %c0_i32_30 = arith.constant 0 : i32
      %c0_i32_31 = arith.constant 0 : i32
      %58 = tpu.memref_slice %arg6[%11, %c0_i32_30, %c0_i32_31] : memref<2x16x256xf32, #tpu.memory_space<vmem>> -> memref<1x16x256xf32, #tpu.memory_space<vmem>>
      %59 = tpu.memref_squeeze %58 : memref<1x16x256xf32, #tpu.memory_space<vmem>> -> memref<16x256xf32, #tpu.memory_space<vmem>>
      %60 = arith.index_cast %45 : i32 to index
      %c2_32 = arith.constant 2 : index
      %61 = vector.load %59[%60, %c2_32] : memref<16x256xf32, #tpu.memory_space<vmem>>, vector<8x128xf32>
      %62 = vector.broadcast %17 : f32 to vector<8x128xf32>
      %63 = arith.mulf %62, %61 : vector<8x128xf32>
      %c0_i32_33 = arith.constant 0 : i32
      %c0_i32_34 = arith.constant 0 : i32
      %64 = tpu.memref_slice %arg6[%11, %c0_i32_33, %c0_i32_34] : memref<2x16x256xf32, #tpu.memory_space<vmem>> -> memref<1x16x256xf32, #tpu.memory_space<vmem>>
      %65 = tpu.memref_squeeze %64 : memref<1x16x256xf32, #tpu.memory_space<vmem>> -> memref<16x256xf32, #tpu.memory_space<vmem>>
      %66 = arith.index_cast %45 : i32 to index
      %c3_35 = arith.constant 3 : index
      %67 = vector.load %65[%66, %c3_35] : memref<16x256xf32, #tpu.memory_space<vmem>>, vector<8x128xf32>
      %68 = vector.broadcast %18 : f32 to vector<8x128xf32>
      %69 = arith.mulf %68, %67 : vector<8x128xf32>
      %c0_i32_36 = arith.constant 0 : i32
      %c0_i32_37 = arith.constant 0 : i32
      %70 = tpu.memref_slice %arg6[%11, %c0_i32_36, %c0_i32_37] : memref<2x16x256xf32, #tpu.memory_space<vmem>> -> memref<1x16x256xf32, #tpu.memory_space<vmem>>
      %71 = tpu.memref_squeeze %70 : memref<1x16x256xf32, #tpu.memory_space<vmem>> -> memref<16x256xf32, #tpu.memory_space<vmem>>
      %72 = arith.index_cast %45 : i32 to index
      %c4_38 = arith.constant 4 : index
      %73 = vector.load %71[%72, %c4_38] : memref<16x256xf32, #tpu.memory_space<vmem>>, vector<8x128xf32>
      %74 = vector.broadcast %19 : f32 to vector<8x128xf32>
      %75 = arith.mulf %74, %73 : vector<8x128xf32>
      %76 = arith.addf %51, %75 : vector<8x128xf32>
      %c0_i32_39 = arith.constant 0 : i32
      %c0_i32_40 = arith.constant 0 : i32
      %77 = tpu.memref_slice %arg6[%11, %c0_i32_39, %c0_i32_40] : memref<2x16x256xf32, #tpu.memory_space<vmem>> -> memref<1x16x256xf32, #tpu.memory_space<vmem>>
      %78 = tpu.memref_squeeze %77 : memref<1x16x256xf32, #tpu.memory_space<vmem>> -> memref<16x256xf32, #tpu.memory_space<vmem>>
      %79 = arith.index_cast %45 : i32 to index
      %c5_41 = arith.constant 5 : index
      %80 = vector.load %78[%79, %c5_41] : memref<16x256xf32, #tpu.memory_space<vmem>>, vector<8x128xf32>
      %81 = vector.broadcast %20 : f32 to vector<8x128xf32>
      %82 = arith.mulf %81, %80 : vector<8x128xf32>
      %83 = arith.addf %57, %82 : vector<8x128xf32>
      %c0_i32_42 = arith.constant 0 : i32
      %c0_i32_43 = arith.constant 0 : i32
      %84 = tpu.memref_slice %arg6[%11, %c0_i32_42, %c0_i32_43] : memref<2x16x256xf32, #tpu.memory_space<vmem>> -> memref<1x16x256xf32, #tpu.memory_space<vmem>>
      %85 = tpu.memref_squeeze %84 : memref<1x16x256xf32, #tpu.memory_space<vmem>> -> memref<16x256xf32, #tpu.memory_space<vmem>>
      %86 = arith.index_cast %45 : i32 to index
      %c6_44 = arith.constant 6 : index
      %87 = vector.load %85[%86, %c6_44] : memref<16x256xf32, #tpu.memory_space<vmem>>, vector<8x128xf32>
      %88 = vector.broadcast %21 : f32 to vector<8x128xf32>
      %89 = arith.mulf %88, %87 : vector<8x128xf32>
      %90 = arith.addf %63, %89 : vector<8x128xf32>
      %c0_i32_45 = arith.constant 0 : i32
      %c0_i32_46 = arith.constant 0 : i32
      %91 = tpu.memref_slice %arg6[%11, %c0_i32_45, %c0_i32_46] : memref<2x16x256xf32, #tpu.memory_space<vmem>> -> memref<1x16x256xf32, #tpu.memory_space<vmem>>
      %92 = tpu.memref_squeeze %91 : memref<1x16x256xf32, #tpu.memory_space<vmem>> -> memref<16x256xf32, #tpu.memory_space<vmem>>
      %93 = arith.index_cast %45 : i32 to index
      %c7_47 = arith.constant 7 : index
      %94 = vector.load %92[%93, %c7_47] : memref<16x256xf32, #tpu.memory_space<vmem>>, vector<8x128xf32>
      %95 = vector.broadcast %22 : f32 to vector<8x128xf32>
      %96 = arith.mulf %95, %94 : vector<8x128xf32>
      %97 = arith.addf %69, %96 : vector<8x128xf32>
      %c0_i32_48 = arith.constant 0 : i32
      %c0_i32_49 = arith.constant 0 : i32
      %98 = tpu.memref_slice %arg6[%11, %c0_i32_48, %c0_i32_49] : memref<2x16x256xf32, #tpu.memory_space<vmem>> -> memref<1x16x256xf32, #tpu.memory_space<vmem>>
      %99 = tpu.memref_squeeze %98 : memref<1x16x256xf32, #tpu.memory_space<vmem>> -> memref<16x256xf32, #tpu.memory_space<vmem>>
      %100 = arith.index_cast %45 : i32 to index
      %c8_50 = arith.constant 8 : index
      %101 = vector.load %99[%100, %c8_50] : memref<16x256xf32, #tpu.memory_space<vmem>>, vector<8x128xf32>
      %102 = vector.broadcast %23 : f32 to vector<8x128xf32>
      %103 = arith.mulf %102, %101 : vector<8x128xf32>
      %104 = arith.addf %76, %103 : vector<8x128xf32>
      %105 = arith.addf %104, %83 : vector<8x128xf32>
      %106 = arith.addf %90, %97 : vector<8x128xf32>
      %107 = arith.addf %105, %106 : vector<8x128xf32>
      %c0_i32_51 = arith.constant 0 : i32
      %c0_i32_52 = arith.constant 0 : i32
      %108 = tpu.memref_slice %arg6[%11, %c0_i32_51, %c0_i32_52] : memref<2x16x256xf32, #tpu.memory_space<vmem>> -> memref<1x16x256xf32, #tpu.memory_space<vmem>>
      %109 = tpu.memref_squeeze %108 : memref<1x16x256xf32, #tpu.memory_space<vmem>> -> memref<16x256xf32, #tpu.memory_space<vmem>>
      %110 = arith.index_cast %45 : i32 to index
      %c4_53 = arith.constant 4 : index
      %111 = vector.load %109[%110, %c4_53] : memref<16x256xf32, #tpu.memory_space<vmem>>, vector<8x128xf32>
      %112 = vector.broadcast %24 : f32 to vector<8x128xf32>
      %113 = arith.mulf %112, %111 : vector<8x128xf32>
      %114 = arith.addf %113, %107 : vector<8x128xf32>
      %115 = arith.index_cast %45 : i32 to index
      %c0_54 = arith.constant 0 : index
      %116 = vector.load %arg5[%115, %c0_54] : memref<16x128xf32, #tpu.memory_space<vmem>>, vector<8x128xf32>
      tpu.vector_store %arg5[%115, %c0_54], %114 {strides = array<i32>} : memref<16x128xf32, #tpu.memory_space<vmem>>, vector<8x128xf32>,
    }
    %c2_i32_21 = arith.constant 2 : i32
    return
  }
  func.func @transform_1(%arg0: i32, %arg1: i32) -> i32 {
    %c0_i32 = arith.constant 0 : i32
    %c0_i32_0 = arith.constant 0 : i32
    return %c0_i32 : i32
  }
  func.func @transform_2(%arg0: i32, %arg1: i32) -> i32 {
    %c0_i32 = arith.constant 0 : i32
    %c0_i32_0 = arith.constant 0 : i32
    return %c0_i32 : i32
  }
  func.func @transform_3(%arg0: i32, %arg1: i32) -> (i32, i32) {
    %c2_i32 = arith.constant 2 : i32
    %0 = arith.muli %arg0, %c2_i32 : i32
    %1 = arith.addi %0, %arg1 : i32
    %c0_i32 = arith.constant 0 : i32
    %c0_i32_0 = arith.constant 0 : i32
    return %1, %c0_i32 : i32, i32
  }
}

</mosaic_0001>

<bundles_post_ra>
// kernel: tpu_custom_call.1
= control target key start
LH: loop header
LB: loop body
LE: loop exit
PB: predicated region body
PF: predicated region fallthrough
CT: control target
= control target key end

     0   :  { %s1401_s0 = inlined_call_operand.hbm [shape: f32[65,128], index: 0, kind: input, shape index: {}]   ;;  %s1402_s1 = inlined_call_operand.vmem [shape: f32[9], index: 1, kind: input, shape index: {}]   ;;  %s1403_s2 = inlined_call_operand.<no memory space> [shape: f32[1], index: 2, kind: input, shape index: {}]   ;;  %s1404_s3 = inlined_call_operand.hbm [shape: f32[64,128], index: 3, kind: output, shape index: {}]  }
   0x1   :  { %1428 = sst [smem:[#allocation30_spill]] %s1402_s1 }
   0x2   :  { %1429 = sst [smem:[#allocation31_spill]] %s1404_s3 }
   0x3   :  { %8 = sst [smem:[#allocation4]] %s1403_s2 }
   0x4   :  { %9 = vsyncpa [#allocation7], 0 }
   0x5   :  { %10 = vsyncpa [#allocation6], 0 }
   0x6   :  { %12 = vsyncpa [#allocation6 + $0x1], 0  ;;  %s1029_s14 = smov 0   ;;  %s1031_s15 = smov 0  }
   0x7   :  { %s1033_s16 = smov 0   ;;  %s1035_s17 = smov 0  }
   0x8   :  { %s1037_s18 = smov 0   ;;  %s1039_s19 = smov 0  }
   0x9   :  { %s1041_s20 = smov 0   ;;  %s1043_s21 = smov 0  }
   0xa LB: > { %1430 = sst [smem:[#allocation17_spill]] %s962_s14  ;;  %s585_s2 = sadd.s32 4294967295, %s990_s21   ;;  %s990_s21 = sphi %s1043_s21, %s18_s21   ;;  %s986_s20 = sphi %s1041_s20, %s1475_s20   ;;  %s982_s19 = sphi %s1039_s19, %s1474_s19   ;;  %s978_s18 = sphi %s1037_s18, %s1473_s18   ;;  %s974_s17 = sphi %s1035_s17, %s1472_s17   ;;  %s970_s16 = sphi %s1033_s16, %s1471_s16   ;;  %s966_s15 = sphi %s1031_s15, %s1470_s15   ;;  %s962_s14 = sphi %s1029_s14, %s1469_s14  }
   0xb   : > { %1431 = sst [smem:[#allocation18_spill]] %s966_s15  ;;  %s586_s22 = sadd.s32 4294967294, %s990_s21  }
   0xc   : > { %1432 = sst [smem:[#allocation19_spill]] %s970_s16  ;;  %s27_s23 = sadd.s32 1, %s982_s19 }
   0xd   : > { %1433 = sst [smem:[#allocation20_spill]] %s982_s19  ;;  %s30_s24 = sadd.s32 1, %s986_s20 }
   0xe   : > { %1434 = sst [smem:[#allocation21_spill]] %s986_s20  ;;  %p28_p0 = scmp.ge.s32.totalorder %s27_s23, 2 }
   0xf   : > { %1435 = sst [smem:[#allocation22_spill]] %s990_s21  ;;  %s587_s25 = sshll.u32 %s986_s20, 1 }
  0x10   : > { %s77_s26 = sadd.s32 %s982_s19, %s587_s25  ;;  %s83_s27 = sadd.s32 1, %s970_s16 }
  0x11   : > { %s1477_s23 = smov (%p28_p0, %s27_s23), 0  ;;  %s1479_s24 = smov (!%p28_p0, %s30_s24), %s986_s20 }
  0x12   : > { %1436 = sst [smem:[#allocation23_spill]] %s1477_s23  ;;  %p93_p1 = scmp.ne.s32.totalorder %s970_s16, %s966_s15 }
  0x13   : > { %p94_p2 = scmp.eq.s32.totalorder %s585_s2, 3  ;;  %p32_p3 = scmp.ge.s32.totalorder %s1479_s24, 2 }
  0x14   : > { %p99_p4 = scmp.ne.s32.totalorder %s966_s15, %s962_s14  ;;  %p100_p6 = scmp.eq.s32.totalorder %s586_s22, 3 }
  0x15   : > { %p1083_p5 = por %p94_p2, %p93_p1  ;;  %s1481_s24 = smov (%p32_p3, %s1479_s24), 0 }
  0x16   : > { %1439 = sst [smem:[#allocation25_spill]] %s1481_s24  ;;  %p1089_p7 = por %p100_p6, %p99_p4 }
  0x17   : > { %s1437_s28 = scalar_select %p1083_p5, 1, 0 }
  0x18   : > { %s1440_s29 = scalar_select %p1089_p7, 1, 0 }
  0x19   : > { %1438 = sst [smem:[#allocation24_spill]] %s1437_s28  ;;  %p589_p8 = scmp.ge.s32.totalorder %s990_s21, 1 }
  0x1a   : > { %1441 = sst [smem:[#allocation26_spill]] %s1440_s29  ;;  %s588_s30 = sshll.u32 %s1481_s24, 1 }
  0x1b   : > { %p107_p9 = scmp.lt.s32.totalorder %s990_s21, 5  ;;  %s79_s4 = sadd.s32 %s588_s30, %s1477_s23 }
  0x1c   : > { %s80_s5 = ssub.s32 %s77_s26, %s79_s4  ;;  %p671_p12 = scmp.eq.s32.totalorder %s585_s2, 0 }
  0x1d   : > { %p108_p10 = pnand %p589_p8, %p107_p9  ;;  %p81_p11 = scmp.eq.s32.totalorder %s80_s5, 0 }
  0x1e   : > { %s1442_s1 = sld [smem:[#allocation30_spill]]  ;;  %s996_s10 = smov [#allocation5]  }
  0x1f   : > { %p663_p13 = pneg %p108_p10 }
  0x20   : > { %s1101_s9 = scalar_select %p81_p11, %s970_s16, %s83_s27  }
  0x21   : > { %p664_p0 = pnand %p671_p12, %p663_p13  ;;  %135 = sbr.rel (%p108_p10) target bundleno = 776 (0x308), region = 28 }
  0x22   : > { %1443 = sst [smem:[#allocation27_spill]] %s1101_s9 }
  0x24   : > { %s119_s8 = sshll.u32 %s1442_s1, 4  ;;  %s120_s8 = int_to_ptr.vmem [resolvable:$true] %s119_s8 }
  0x25   : > { %666 = dma.vmem_to_smem (!%p664_p0), %s120_s8, 16, %s996_s10, [#allocation7]  }
  0x26   : > { %949 = dma.done.wait (%p671_p12), [#allocation7], 16  }
  0x27   : > { %951 = vsyncadd (%p671_p12), [#allocation7], 4294967280 }
  0x28   : > { %142 = sfence }
  0x29   : > { %s1405_s11 = sand.u32 1, %s966_s15   ;;  %s594_s12 = sshll.u32 %s978_s18, 1 }
  0x2a   : > { %s1107_s13 = sshll.u32 %s1405_s11, 4  ;;  %s1110_s2 = sadd.s32 %s974_s17, %s594_s12 }
  0x2b   : > { %1444 = sst [smem:[#allocation28_spill]] %s1107_s13  ;;  %p159_p1 = scmp.lt.s32.totalorder %s974_s17, 0 }
  0x2c   : > { %1445 = sst [smem:[#allocation29_spill]] %s1110_s2  ;;  %s160_s22 = ssub.s32 0, %s974_s17 }
  0x2d   : > { %s595_s25 = smin.u32 %s974_s17, %s160_s22  ;;  %p673_p2 = scmp.eq.s32.totalorder %s974_s17, 0 }
  0x2e   : > { %s162_s26 = sand.u32 1, %s595_s25   ;;  %s1406_s27 = sshll.u32 %s1110_s2, 4 }
  0x2f   : > { %s163_s30 = ssub.s32 0, %s162_s26  ;;  %s1122_s6 = scalar_lea.hbm %s1401_s0, %s1406_s27 }
  0x30   : > { %s1483_s30 = smov (!%p159_p1, %s163_s30), %s162_s26  ;;  %s183_s18 = sshll.u32 %s1122_s6, 4  ;;  %s1125_s18 = int_to_ptr.hbm [resolvable:$true] %s183_s18 }
  0x31   : > { %p597_p3 = scmp.lt.s32.totalorder %s1483_s30, 0  ;;  %s169_s7 = sadd.s32 2, %s1483_s30 }
  0x32   : > { %s1149_s8 = scalar_lea.hbm %s1401_s0, 72 }
  0x33   : > { %s1485_s7 = smov (!%p597_p3, %s169_s7), %s1483_s30  ;;  %s772_s30 = sshra.s32 %s1125_s18, 4  ;;  %s773_s30 = int_to_ptr.hbm [resolvable:$true] %s772_s30 }
  0x34   : > { %s644_s10 = sshll.u32 %s1485_s7, 5  ;;  %s602_s12 = sshll.u32 %s1485_s7, 1 }
  0x35   : > { %s1132_s22 = scalar_lea.vmem [#allocation2], %s644_s10  ;;  %s1138_s4 = scalar_lea.sflag [#allocation3], %s602_s12 }
  0x36   : > { %s185_s25 = sshll.u32 %s1132_s22, 4  ;;  %s1141_s5 = scalar_lea.sflag %s1138_s4, 1 [#allocation3]  ;;  %s1136_s25 = int_to_ptr.vmem [resolvable:$true] %s185_s25 }
  0x37   : > { %s774_s11 = scalar_lea.hbm %s773_s30, 16  ;;  %p779_p9 = scmp.lt.s32.totalorder %s773_s30, %s1401_s0 }
  0x38   : > { %p775_p4 = scmp.ne.s32.totalorder %s773_s30, %s774_s11  ;;  %p780_p10 = scmp.lt.s32.totalorder %s1149_s8, %s774_s11 }
  0x3a   : > { %p776_p6 = pnand %p775_p4, %p673_p2  ;;  %p781_p11 = por %p780_p10, %p779_p9 }
  0x3c   : > { %p777_p8 = pneg %p776_p6 }
  0x3e   : > { %p782_p12 = pnand %p781_p11, %p777_p8 }
  0x40   : > { %785 = shalt.err (!%p782_p12)  }
  0x41   : > { %s786_s12 = sshra.s32 %s1136_s25, 4  ;;  %s997_s27 = smov [#allocation2]   ;;  %s787_s12 = int_to_ptr.vmem [resolvable:$true] %s786_s12 }
  0x42   : > { %s788_s24 = scalar_lea.vmem %s787_s12, 16  ;;  %s1158_s10 = scalar_lea.vmem %s997_s27, 64 }
  0x43   : > { %p789_p13 = scmp.ne.s32.totalorder %s787_s12, %s788_s24  ;;  %p793_p3 = scmp.lt.s32.totalorder %s787_s12, [#allocation2] }
  0x44   : > { %p794_p4 = scmp.lt.s32.totalorder %s1158_s10, %s788_s24 }
  0x45   : > { %p790_p0 = pnand %p789_p13, %p673_p2 }
  0x46   : > { %p795_p6 = por %p794_p4, %p793_p3 }
  0x47   : > { %p791_p1 = pneg %p790_p0 }
  0x49   : > { %p796_p7 = pnand %p795_p6, %p791_p1 }
  0x4b   : > { %799 = shalt.err (!%p796_p7)  }
  0x4c   : > { %s1413_s1 = smov 128   ;;  %s1415_s11 = smov 256  }
  0x4d   : > { %s1417_s26 = smov 8   ;;  %s1446_s24 = scalar_lea.hbm %s1122_s6, 1 }
  0x4e   : > { %656 = dma.hbm_to_vmem [thread:$0]  (%p673_p2), %s1125_s18, 256, %s1136_s25, %s1138_s4, %s1413_s1, %s1415_s11, %s1417_s26 }
  0x4f   : > { %s1171_s30 = sshll.u32 %s1446_s24, 4  ;;  %s1447_s12 = scalar_lea.vmem %s1132_s22, 8 [#allocation2]  ;;  %s198_s30 = int_to_ptr.hbm [resolvable:$true] %s1171_s30 }
  0x50   : > { %s1175_s27 = sshll.u32 %s1447_s12, 4  ;;  %s800_s23 = sshra.s32 %s198_s30, 4  ;;  %s200_s27 = int_to_ptr.vmem [resolvable:$true] %s1175_s27  ;;  %s801_s23 = int_to_ptr.hbm [resolvable:$true] %s800_s23 }
  0x51   : > { %s802_s20 = scalar_lea.hbm %s801_s23, 16  ;;  %p807_p10 = scmp.lt.s32.totalorder %s801_s23, %s1401_s0 }
  0x52   : > { %p803_p7 = scmp.ne.s32.totalorder %s801_s23, %s802_s20  ;;  %p808_p11 = scmp.lt.s32.totalorder %s1149_s8, %s802_s20 }
  0x54   : > { %p804_p8 = pnand %p803_p7, %p673_p2  ;;  %p809_p12 = por %p808_p11, %p807_p10 }
  0x56   : > { %p805_p9 = pneg %p804_p8 }
  0x58   : > { %p810_p13 = pnand %p809_p12, %p805_p9 }
  0x5a   : > { %813 = shalt.err (!%p810_p13)  }
  0x5b   : > { %s814_s18 = sshra.s32 %s200_s27, 4  ;;  %s815_s18 = int_to_ptr.vmem [resolvable:$true] %s814_s18 }
  0x5c   : > { %s816_s25 = scalar_lea.vmem %s815_s18, 16  ;;  %p821_p4 = scmp.lt.s32.totalorder %s815_s18, [#allocation2] }
  0x5d   : > { %p817_p0 = scmp.ne.s32.totalorder %s815_s18, %s816_s25  ;;  %p822_p6 = scmp.lt.s32.totalorder %s1158_s10, %s816_s25 }
  0x5f   : > { %p818_p1 = pnand %p817_p0, %p673_p2  ;;  %p823_p7 = por %p822_p6, %p821_p4 }
  0x61   : > { %p819_p3 = pneg %p818_p1 }
  0x63   : > { %p824_p8 = pnand %p823_p7, %p819_p3 }
  0x65   : > { %827 = shalt.err (!%p824_p8)  }
  0x66   : > { %657 = dma.hbm_to_vmem [thread:$0]  (%p673_p2), %s198_s30, 256, %s200_s27, %s1141_s5, %s1413_s1, %s1415_s11, %s1417_s26 }
  0x67   : > { %s1194_s19 = sld [smem:[#allocation5]] }
  0x68   : > { %s1196_s20 = sld [smem:[#allocation5 + $0x1]] }
  0x69   : > { %s1198_s23 = sld [smem:[#allocation5 + $0x2]] }
  0x6a   : > { %s1200_s9 = sld [smem:[#allocation5 + $0x3]] }
  0x6b   : > { %s1202_s24 = sld [smem:[#allocation5 + $0x4]] }
  0x6c   : > { %s1204_s12 = sld [smem:[#allocation5 + $0x5]] }
  0x6d   : > { %s1206_s18 = sld [smem:[#allocation5 + $0x6]] }
  0x6e   : > { %s1208_s25 = sld [smem:[#allocation5 + $0x7]] }
  0x6f   : > { %s1210_s16 = sld [smem:[#allocation5 + $0x8]] }
  0x70   : > { %s1212_s29 = sld [smem:[#allocation4]] }
  0x71   : > { %952 = dma.done.wait %s1138_s4, 256 }
  0x72   : > { %953 = vsyncadd %s1138_s4, 4294967040 }
  0x73   : > { %954 = dma.done.wait %s1141_s5, 256 }
  0x74   : > { %955 = vsyncadd %s1141_s5, 4294967040  ;;  %s225_s27 = sadd.s32 1, %s974_s17  ;;  %s231_s1 = ssub.s32 1, %s1485_s7 }
  0x75   : > { %p1221_p2 = scmp.lt.s32.totalorder %s225_s27, 2  ;;  %s512_s26 = scalar_lea.hbm %s1122_s6, 16 }
  0x76   : > { %s646_s14 = sshll.u32 %s231_s1, 5  ;;  %s1226_s30 = sshll.u32 %s231_s1, 1 }
  0x77   : > { %s1228_s4 = sshll.u32 %s512_s26, 4  ;;  %s237_s5 = scalar_lea.vmem [#allocation2], %s646_s14  ;;  %s241_s4 = int_to_ptr.hbm [resolvable:$true] %s1228_s4 }
  0x78   : > { %s1231_s21 = sshll.u32 %s237_s5, 4  ;;  %s1234_s17 = scalar_lea.vmem %s237_s5, 8 [#allocation2]  ;;  %s243_s21 = int_to_ptr.vmem [resolvable:$true] %s1231_s21 }
  0x79   : > { %s239_s7 = scalar_lea.sflag [#allocation3], %s1226_s30  ;;  %s828_s27 = sshra.s32 %s241_s4, 4  ;;  %s829_s27 = int_to_ptr.hbm [resolvable:$true] %s828_s27 }
  0x7a   : > { %s830_s28 = scalar_lea.hbm %s829_s27, 16  ;;  %p835_p12 = scmp.lt.s32.totalorder %s829_s27, %s1401_s0 }
  0x7b   : > { %p831_p9 = scmp.ne.s32.totalorder %s829_s27, %s830_s28  ;;  %p836_p13 = scmp.lt.s32.totalorder %s1149_s8, %s830_s28 }
  0x7d   : > { %p832_p10 = pnand %p831_p9, %p1221_p2  ;;  %p837_p0 = por %p836_p13, %p835_p12 }
  0x7f   : > { %p833_p11 = pneg %p832_p10 }
  0x81   : > { %p838_p1 = pnand %p837_p0, %p833_p11 }
  0x83   : > { %841 = shalt.err (!%p838_p1)  }
  0x84   : > { %s842_s14 = sshra.s32 %s243_s21, 4  ;;  %s843_s14 = int_to_ptr.vmem [resolvable:$true] %s842_s14 }
  0x85   : > { %s844_s30 = scalar_lea.vmem %s843_s14, 16  ;;  %p849_p7 = scmp.lt.s32.totalorder %s843_s14, [#allocation2] }
  0x86   : > { %p845_p3 = scmp.ne.s32.totalorder %s843_s14, %s844_s30  ;;  %p850_p8 = scmp.lt.s32.totalorder %s1158_s10, %s844_s30 }
  0x88   : > { %p846_p4 = pnand %p845_p3, %p1221_p2  ;;  %p851_p9 = por %p850_p8, %p849_p7 }
  0x8a   : > { %p847_p6 = pneg %p846_p4 }
  0x8c   : > { %p852_p10 = pnand %p851_p9, %p847_p6 }
  0x8e   : > { %855 = shalt.err (!%p852_p10)  }
  0x8f   : > { %s1449_s28 = smov 8   ;;  %s1450_s5 = smov 256  }
  0x90   : > { %s1451_s27 = smov 128   ;;  %s1259_s1 = scalar_lea.sflag %s239_s7, 1 [#allocation3] }
  0x91   : > { %659 = dma.hbm_to_vmem [thread:$0]  (%p1221_p2), %s241_s4, 256, %s243_s21, %s239_s7, %s1451_s27, %s1450_s5, %s1449_s28 }
  0x92   : > { %s256_s26 = sshll.u32 %s1234_s17, 4  ;;  %s521_s14 = scalar_lea.hbm %s1122_s6, 17  ;;  %s1263_s26 = int_to_ptr.vmem [resolvable:$true] %s256_s26 }
  0x93   : > { %s1265_s30 = sshll.u32 %s521_s14, 4  ;;  %s255_s30 = int_to_ptr.hbm [resolvable:$true] %s1265_s30 }
  0x94   : > { %s856_s15 = sshra.s32 %s255_s30, 4  ;;  %s857_s15 = int_to_ptr.hbm [resolvable:$true] %s856_s15 }
  0x95   : > { %s858_s3 = scalar_lea.hbm %s857_s15, 16  ;;  %p863_p0 = scmp.lt.s32.totalorder %s857_s15, %s1401_s0 }
  0x96   : > { %p859_p11 = scmp.ne.s32.totalorder %s857_s15, %s858_s3  ;;  %p864_p1 = scmp.lt.s32.totalorder %s1149_s8, %s858_s3 }
  0x98   : > { %p860_p12 = pnand %p859_p11, %p1221_p2  ;;  %p865_p3 = por %p864_p1, %p863_p0 }
  0x9a   : > { %p861_p13 = pneg %p860_p12 }
  0x9c   : > { %p866_p4 = pnand %p865_p3, %p861_p13 }
  0x9e   : > { %869 = shalt.err (!%p866_p4)  }
  0x9f   : > { %s870_s21 = sshra.s32 %s1263_s26, 4  ;;  %s871_s21 = int_to_ptr.vmem [resolvable:$true] %s870_s21 }
  0xa0   : > { %s872_s6 = scalar_lea.vmem %s871_s21, 16  ;;  %p877_p9 = scmp.lt.s32.totalorder %s871_s21, [#allocation2] }
  0xa1   : > { %p873_p6 = scmp.ne.s32.totalorder %s871_s21, %s872_s6  ;;  %p878_p10 = scmp.lt.s32.totalorder %s1158_s10, %s872_s6 }
  0xa3   : > { %p874_p7 = pnand %p873_p6, %p1221_p2  ;;  %p879_p11 = por %p878_p10, %p877_p9 }
  0xa5   : > { %p875_p8 = pneg %p874_p7 }
  0xa7   : > { %p880_p12 = pnand %p879_p11, %p875_p8 }
  0xa9   : > { %883 = shalt.err (!%p880_p12)  }
  0xaa   : > { %660 = dma.hbm_to_vmem [thread:$0]  (%p1221_p2), %s255_s30, 256, %s1263_s26, %s1259_s1, %s1451_s27, %s1450_s5, %s1449_s28 }
  0xab   : > { %s1285_s3 = smov 0  }
  0xac LB: >> { %s629_s15 = sshll.u32 %s994_s3, 3  ;;  %v331_v0 = vstv %s1208_s25  ;;  %v303_v1 = vstv %s1204_s12  ;;  %s1001_s10 = smov 124   ;;  %v317_v8 = vstv %s1206_s18  ;;  %v287_v12 = vstv %s1200_s9  ;;  %s994_s3 = sphi %s1285_s3, %s267_s3  }
  0xad   : >> { %s272_s13 = sshra.s32 %s629_s15, 3  ;;  %vm299_vm0 = vcmask 1014784   ;;  %s1002_s11 = smov 127   ;;  %v345_v19 = vstv %s1210_s16  ;;  %v290_v20 = vstv %s1202_s24  ;;  %v281_v24 = vstv %s1196_s20 }
  0xae   : >> { %s649_s2 = sshll.u32 %s272_s13, 4  ;;  %s1003_s4 = smov 120   ;;  %v284_v34 = vstv %s1198_s23  ;;  %vm364_vm1 = vcmask 1039360   ;;  %v278_v49 = vstv %s1194_s19  ;;  %vm354_vm2 = vcmask 982016  }
  0xaf   : >> { %s276_s8 = scalar_lea.vmem %s1132_s22, %s649_s2 [#allocation2]  ;;  %s1004_s17 = smov 126   ;;  %vm385_vm3 = vcmask 1031168  }
  0xb0   : >> { %v1296_v2 = vld [vmem:[%s276_s8] sm:$0xff]  ;;  %v1302_v5 = vld [vmem:[%s276_s8 + $0x8] sm:$0xff]  ;;  %s1452_s7 = sld [smem:[#allocation28_spill]]  ;;  %s1005_s28 = smov 4  }
  0xb1   : >> { %v332_v3 = vmul.f32 %v331_v0, %v1296_v2  ;;  %v304_v4 = vmul.f32 %v303_v1, %v1296_v2  ;;  %v333_v6 = vmul.f32 %v331_v0, %v1302_v5  ;;  %v305_v7 = vmul.f32 %v303_v1, %v1302_v5  ;;  %s267_s3 = sadd.s32 1, %s994_s3  }
  0xb2   : >> { %v318_v9 = vmul.f32 %v317_v8, %v1296_v2  ;;  %v319_v10 = vmul.f32 %v317_v8, %v1302_v5  ;;  %v289_v13 = vmul.f32 %v287_v12, %v1302_v5  ;;  %v288_v14 = vmul.f32 %v287_v12, %v1296_v2  ;;  %p264_p2 = scmp.ge.s32.totalorder %s267_s3, 2  }
  0xb3   : >> { %336 = vrot.lane.b32.xlu0 %v332_v3, %s1001_s10  ;;  %308 = vrot.lane.b32.xlu1 %v304_v4, %s1001_s10  ;;  %v346_v21 = vmul.f32 %v345_v19, %v1296_v2  ;;  %v292_v22 = vmul.f32 %v290_v20, %v1302_v5  ;;  %v291_v26 = vmul.f32 %v290_v20, %v1296_v2  ;;  %v389_v0 = vstv %s1212_s29  ;;  %s1454_s1 = sld [smem:[#allocation29_spill]] (%p264_p2) }
  0xb4   : >> { %322 = vrot.lane.b32.xlu2 %v318_v9, %s1001_s10  ;;  %v283_v27 = vmul.f32 %v281_v24, %v1302_v5  ;;  %v282_v28 = vmul.f32 %v281_v24, %v1296_v2  ;;  %v347_v32 = vmul.f32 %v345_v19, %v1302_v5  ;;  %v286_v35 = vmul.f32 %v284_v34, %v1302_v5  ;;  %s1456_s21 = sld [smem:[#allocation31_spill]] (%p264_p2) }
  0xb5   : >> { %v285_v37 = vmul.f32 %v284_v34, %v1296_v2  ;;  %v279_v50 = vmul.f32 %v278_v49, %v1296_v2  ;;  %v390_v1 = vmul.f32 %v389_v0, %v1296_v2  ;;  %v391_v3 = vmul.f32 %v389_v0, %v1302_v5  ;;  %s1458_s13 = sld [smem:[#allocation28_spill]] (%p264_p2) }
  0xb6   : >> { %s1453_s5 = scalar_lea.vmem [#allocation8], %s1452_s7  ;;  %s1459_s2 = sld [smem:[#allocation18_spill]] (%p264_p2) }
  0xb7   : >> { %s406_s27 = scalar_lea.vmem %s1453_s5, %s629_s15 [#allocation8] }
  0xb9   : > { %s1455_s26 = sshll.u32 (%p264_p2), %s1454_s1, 4 }
  0xba   : > { %s1457_s6 = smov (%p264_p2), %s1456_s21  ;;  %s422_s15 = scalar_lea.hbm (%p264_p2), %s1456_s21, %s1455_s26 }
  0xbb   : >> { %338 = vrot.lane.b32.xlu0 %v333_v6, %s1001_s10  ;;  %310 = vrot.lane.b32.xlu1 %v305_v7, %s1001_s10  ;;  %s904_s22 = scalar_lea.hbm (%p264_p2), %s1457_s6, 64 }
  0xbc   : >> { %324 = vrot.lane.b32.xlu2 %v319_v10, %s1001_s10 }
  0xc4   : >> { %295 = vrot.lane.b32.xlu2 %v291_v26, %s1001_s10 }
  0xcc   : >> { %352 = vrot.lane.b32.xlu2 %v347_v32, %s1003_s4 }
 0x10e   : >> { %v323_v33 = vpop.permute.xlu2 %322 }
 0x116   : >> { %v325_v36 = vpop.permute.xlu2 %324 }
 0x117   : >> { %v330_v38 = vadd.f32 %v325_v36, %v286_v35  ;;  %v326_v39 = vsel %vm299_vm0, %v323_v33, %v325_v36 }
 0x118   : >> { %v329_v41 = vadd.f32 %v326_v39, %v285_v37 }
 0x11e   : >> { %v296_v46 = vpop.permute.xlu2 %295 }
 0x125   : >> { %v337_v11 = vpop.permute.xlu0 %336  ;;  %v309_v23 = vpop.permute.xlu1 %308 }
 0x126   : >> { %v353_v52 = vpop.permute.xlu2 %352 }
 0x12d   : >> { %v339_v15 = vpop.permute.xlu0 %338  ;;  %v311_v25 = vpop.permute.xlu1 %310 }
 0x12e   : >> { %v340_v16 = vsel %vm299_vm0, %v337_v11, %v339_v15  ;;  %v344_v17 = vadd.f32 %v339_v15, %v289_v13  ;;  %v312_v29 = vsel %vm299_vm0, %v309_v23, %v311_v25  ;;  %v316_v31 = vadd.f32 %v311_v25, %v283_v27 }
 0x12f   : >> { %v343_v18 = vadd.f32 %v340_v16, %v288_v14  ;;  %v315_v30 = vadd.f32 %v312_v29, %v282_v28 }
 0x130   : >> { %372 = vrot.lane.b32.xlu1 %v344_v17, %s1002_s11 }
 0x131   : >> { %370 = vrot.lane.b32.xlu0 %v343_v18, %s1002_s11 }
 0x138   : >> { %350 = vrot.lane.b32.xlu1 %v346_v21, %s1003_s4  ;;  %s425_s4 = sshll.u32 (%p264_p2), %s422_s15, 4  ;;  %s426_s4 = int_to_ptr.hbm [resolvable:$true] %s425_s4 }
 0x139   : >> { %297 = vrot.lane.b32.xlu0 %v292_v22, %s1001_s10 }
 0x140   : >> { %362 = vrot.lane.b32.xlu1 %v316_v31, %s1002_s11 }
 0x141   : >> { %360 = vrot.lane.b32.xlu0 %v315_v30, %s1002_s11 }
 0x1a2   : >> { %v373_v40 = vpop.permute.xlu1 %372 }
 0x1a3   : >> { %v378_v42 = vadd.f32 %v373_v40, %v330_v38  ;;  %v371_v43 = vpop.permute.xlu0 %370 }
 0x1a4   : >> { %v374_v44 = vsel %vm364_vm1, %v371_v43, %v373_v40 }
 0x1a5   : >> { %v377_v45 = vadd.f32 %v374_v44, %v329_v41  ;;  %383 = vrot.lane.b32.xlu0 %v378_v42, %s1004_s17 }
 0x1a7   : >> { %381 = vrot.lane.b32.xlu2 %v377_v45, %s1004_s17  ;;  %s1462_s17 = sand.u32 (%p264_p2), 1, %s1459_s2  }
 0x1a8   : > { %s409_s7 = scalar_lea.sflag (%p264_p2), [#allocation6], %s1462_s17 }
 0x1aa   : >> { %v351_v48 = vpop.permute.xlu1 %350 }
 0x1ab   : >> { %v298_v47 = vpop.permute.xlu0 %297  ;;  %v355_v55 = vsel %vm354_vm2, %v351_v48, %v353_v52 }
 0x1ac   : >> { %v300_v51 = vsel %vm299_vm0, %v296_v46, %v298_v47 }
 0x1ad   : >> { %v302_v53 = vadd.f32 %v300_v51, %v279_v50 }
 0x1af   : >> { %v357_v57 = vadd.f32 %v355_v55, %v302_v53 }
 0x1b2   : >> { %v363_v56 = vpop.permute.xlu1 %362 }
 0x1b3   : >> { %v361_v54 = vpop.permute.xlu0 %360 }
 0x1b4   : >> { %v365_v58 = vsel %vm364_vm1, %v361_v54, %v363_v56 }
 0x1b5   : >> { %v367_v60 = vadd.f32 %v365_v58, %v357_v57 }
 0x201   : >> { %v382_v59 = vpop.permute.xlu2 %381 }
 0x217   : >> { %v384_v61 = vpop.permute.xlu0 %383 }
 0x218   : >> { %v386_v62 = vsel %vm385_vm3, %v382_v59, %v384_v61 }
 0x219   : >> { %v388_v63 = vadd.f32 %v386_v62, %v367_v60 }
 0x21b   : >> { %393 = vrot.lane.b32.xlu1 %v388_v63, %s1005_s28  ;;  %s898_s28 = sshra.s32 (%p264_p2), %s426_s4, 4  ;;  %s899_s28 = int_to_ptr.hbm [resolvable:$true] %s898_s28 }
 0x21c   : > { %s900_s3 = scalar_lea.hbm (%p264_p2), %s899_s28, 16  ;;  %p905_p3 = scmp.lt.s32.totalorder (%p264_p2), %s899_s28, %s1457_s6 }
 0x21d   : > { %p901_p13 = scmp.ne.s32.totalorder (%p264_p2), %s899_s28, %s900_s3  ;;  %p906_p4 = scmp.lt.s32.totalorder (%p264_p2), %s904_s22, %s900_s3 }
 0x21f   : > { %p902_p0 = pnand (%p264_p2), %p901_p13, %p1083_p5  ;;  %p907_p6 = por (%p264_p2), %p906_p4, %p905_p3 }
 0x221   : > { %p903_p1 = pneg (%p264_p2), %p902_p0 }
 0x223   : > { %p908_p7 = pnand (%p264_p2), %p907_p6, %p903_p1 }
 0x28d   : >> { %v394_v4 = vpop.permute.xlu1 %393 }
 0x28e   : >> { %v396_v6 = vadd.f32 %v394_v4, %v390_v1  ;;  %v397_v7 = vadd.f32 %v394_v4, %v391_v3 }
 0x290   : >> { %402 = vrot.lane.b32.xlu0 %v397_v7, %s1001_s10  ;;  %400 = vrot.lane.b32.xlu2 %v396_v6, %s1001_s10  ;;  %s1461_s10 = scalar_lea.vmem (%p264_p2), [#allocation8], %s1458_s13 }
 0x291   : > { %s423_s11 = sshll.u32 (%p264_p2), %s1461_s10, 4  ;;  %s424_s11 = int_to_ptr.vmem [resolvable:$true] %s423_s11 }
 0x2ea   : >> { %v401_v8 = vpop.permute.xlu2 %400 }
 0x300   : > { %266 = sbr.rel (!%p264_p2) target bundleno = 172 (0xac), region = 100 }
 0x302   : >> { %v403_v9 = vpop.permute.xlu0 %402 }
 0x303   : >> { %v404_v10 = vsel %vm299_vm0, %v401_v8, %v403_v9 }
 0x304   : >> { %407 = vst [vmem:[%s406_s27] sm:$0xff] %v404_v10 }
 0x305   : > { %911 = shalt.err (!%p908_p7)
}
 0x306   : > { %s1463_s23 = smov 8   ;;  %s1464_s9 = smov 128  }
 0x307   : > { %661 = dma.vmem_to_hbm [thread:$0]  (%p1083_p5), %s424_s11, 256, %s426_s4, %s409_s7, %s1464_s9, %s1464_s9, %s1463_s23  }
 0x308 PF: > { %s1465_s24 = sld [smem:[#allocation22_spill]] }
 0x309   : > { %s1466_s12 = sld [smem:[#allocation17_spill]] }
 0x30a   : > { %s1467_s18 = sld [smem:[#allocation26_spill]] }
 0x30e   : > { %p675_p8 = scmp.ge.s32.totalorder %s1465_s24, 2 }
 0x30f   : > { %s440_s25 = sand.u32 1, %s1466_s12  }
 0x310   : > { %p1468_p9 = scmp.ne.s32.totalorder %s1467_s18, 0  ;;  %s441_s5 = scalar_lea.sflag [#allocation6], %s440_s25 }
 0x312   : > { %p668_p10 = pnand %p675_p8, %p1468_p9 }
 0x314   : > { %p669_p11 = pneg %p668_p10 }
 0x316   : > { %957 = dma.done.wait (%p669_p11), %s441_s5, 256  }
 0x317   : > { %959 = vsyncadd (%p669_p11), %s441_s5, 4294967040  ;;  %s18_s21 = sadd.s32 1, %s1465_s24   ;;  %s1469_s14 = sld [smem:[#allocation18_spill]] }
 0x318   : > { %p15_p12 = scmp.ge.s32.totalorder %s18_s21, 6   ;;  %s1470_s15 = sld [smem:[#allocation19_spill]] }
 0x319   : > { %s1471_s16 = sld [smem:[#allocation27_spill]] }
 0x31a   : > { %s1472_s17 = sld [smem:[#allocation20_spill]]  ;;  %17 = sbr.rel (!%p15_p12) target bundleno = 10 (0xa), region = 111 }
 0x31b   : > { %s1473_s18 = sld [smem:[#allocation21_spill]] }
 0x31c   : > { %s1474_s19 = sld [smem:[#allocation23_spill]] }
 0x31d   : > { %s1475_s20 = sld [smem:[#allocation25_spill]] }
 0x31f   :  { %447 = vsyncpa [#allocation6], 1 }
 0x320   :  { %449 = vsyncpa [#allocation6 + $0x1], 1 }
 0x321   :  { %450 = vsyncpa [#allocation7], 1 }
 0x322   :  { %452 = vsyncpa [#allocation7 + $0x1], 1 }
 0x323   :  { %453 = vsyncmov [#allocation3] }
 0x326   :  { %s454_s27 = vpop.sfrf %453 }
 0x327   :  { %p640_p5 = scmp.ne.s32.totalorder %s454_s27, 0 }
 0x329   :  { %458 = shalt.err (%p640_p5)  }
 0x32a   :  { %460 = vsyncmov [#allocation3 + $0x1] }
 0x32d   :  { %s461_s1 = vpop.sfrf %460 }
 0x32e   :  { %p641_p2 = scmp.ne.s32.totalorder %s461_s1, 0 }
 0x330   :  { %465 = shalt.err (%p641_p2)  }
 0x331   :  { %467 = vsyncmov [#allocation3 + $0x2] }
 0x334   :  { %s468_s26 = vpop.sfrf %467 }
 0x335   :  { %p642_p13 = scmp.ne.s32.totalorder %s468_s26, 0 }
 0x337   :  { %472 = shalt.err (%p642_p13)  }
 0x338   :  { %474 = vsyncmov [#allocation3 + $0x3] }
 0x33b   :  { %s475_s30 = vpop.sfrf %474 }
 0x33c   :  { %p643_p0 = scmp.ne.s32.totalorder %s475_s30, 0 }
 0x33e   :  { %479 = shalt.err (%p643_p0)  }

</bundles_post_ra>
